<compile_context>
chip_gen: v6e
topology: v6e:2x2x1
jax: 0.10.0
libtpu: 0.0.40
codegen_flags: <defaults>
</compile_context>

<pallas_src>
import functools

import jax
import jax.numpy as jnp
import numpy as np
from jax import lax
from jax.experimental import pallas as pl
from jax.experimental.pallas import tpu as pltpu


def _round_up(x, m):
    return ((x + m - 1) // m) * m


def _sublane_granule(dtype):
    # f32 -> 8 rows, bf16/f16 -> 16, int8/fp8 -> 32 (sub-32-bit packs sublanes).
    bits = jnp.dtype(dtype).itemsize * 8
    return max(8, 256 // bits)


def _pick_k_tiling(in_dim, tile_k):
    """Pick (tk, Kp) with tk | Kp so K zero-padding stays <= 127 columns."""
    if in_dim <= tile_k:
        return in_dim, in_dim  # single full-K block, no padding at all
    kp = _round_up(in_dim, 128)
    n128 = kp // 128
    best = 128
    d = 1
    while d * d <= n128:
        if n128 % d == 0:
            for cand in (d * 128, (n128 // d) * 128):
                if cand <= tile_k:
                    best = max(best, cand)
        d += 1
    return best, kp


def _linear_kernel(*refs, has_bias, acc_in_output):
    # Ref layout: x, w, [bias], out, [acc scratch]
    if has_bias:
        x_ref, w_ref, b_ref = refs[0], refs[1], refs[2]
        rest = refs[3:]
    else:
        x_ref, w_ref = refs[0], refs[1]
        b_ref = None
        rest = refs[2:]
    if acc_in_output:
        (o_ref,) = rest
        acc_ref = o_ref          # f32 output block is k-invariant -> resident
    else:
        o_ref, acc_ref = rest

    k = pl.program_id(2)

    @pl.when(k == 0)
    def _():
        acc_ref[...] = jnp.zeros_like(acc_ref)

    # y_tile += x_tile @ w_tile.T : contract the last axis of both operands.
    # Native (out_dim, in_dim) weight layout; NT matmul is handled by the MXU's
    # transposed stationary-operand path (no per-tile XLU transpose).
    acc_ref[...] += lax.dot_general(
        x_ref[...],
        w_ref[...],
        dimension_numbers=(((1,), (1,)), ((), ())),
        preferred_element_type=jnp.float32,
    )

    if has_bias or not acc_in_output:
        @pl.when(k == pl.num_programs(2) - 1)
        def _():
            if acc_in_output:
                # o_ref already holds the f32 accumulator; just add bias in f32.
                o_ref[...] = acc_ref[...] + b_ref[...]
            else:
                acc = acc_ref[...]
                if has_bias:
                    acc = acc + b_ref[...]
                o_ref[...] = acc.astype(o_ref.dtype)


def linear_forward(
    x,
    weight,
    bias=None,
    *,
    tile_m=512,
    tile_n=512,
    tile_k=1024,
    compute_dtype=jnp.bfloat16,
):
    """y = x @ weight.T + bias, matching torch.nn.Linear semantics.

    x:      (..., in_dim)
    weight: (out_dim, in_dim)  -- native torch layout, never transposed in HBM
    bias:   (out_dim,) or None

    The MXU consumes `compute_dtype` operands (default bf16); accumulation,
    bias add and the stored output remain f32-precision.
    """
    in_dim = x.shape[-1]
    out_dim = weight.shape[0]
    lead = x.shape[:-1]
    out_dtype = x.dtype

    x2d = x.reshape(-1, in_dim).astype(compute_dtype)
    w = weight.astype(compute_dtype)
    M = x2d.shape[0]

    # ---- tile selection -----------------------------------------------------
    m_granule = _sublane_granule(compute_dtype)
    tm = min(tile_m, _round_up(M, m_granule))
    tn = min(tile_n, _round_up(out_dim, 128))
    tk, Kp = _pick_k_tiling(in_dim, tile_k)

    # Keep both v7x TensorCores busy: prefer >=2 blocks on the parallel axes.
    if pl.cdiv(M, tm) * pl.cdiv(out_dim, tn) < 2 and tn >= 256:
        tn //= 2

    # ---- K zero-padding only (ragged M/N edge blocks are masked by Pallas) ---
    if Kp != in_dim:
        x2d = jnp.pad(x2d, ((0, 0), (0, Kp - in_dim)))
        w = jnp.pad(w, ((0, 0), (0, Kp - in_dim)))

    grid = (pl.cdiv(M, tm), pl.cdiv(out_dim, tn), Kp // tk)

    has_bias = bias is not None
    acc_in_output = jnp.dtype(out_dtype) == jnp.dtype(jnp.float32)

    in_specs = [pl.BlockSpec((tm, tk), lambda i, j, k: (i, k))]  # activations
    # Decode-like regime (one row block, many streamed weight panels): the
    # kernel is weight-bandwidth bound, so triple-buffer the panel stream.
    if M <= tm and grid[1] * grid[2] >= 3:
        w_spec = pl.BlockSpec(
            (tn, tk), lambda i, j, k: (j, k), pipeline_mode=pl.Buffered(3)
        )
    else:
        w_spec = pl.BlockSpec((tn, tk), lambda i, j, k: (j, k))
    in_specs.append(w_spec)

    operands = [x2d, w]
    if has_bias:
        b2d = bias.astype(jnp.float32).reshape(1, out_dim)
        in_specs.append(pl.BlockSpec((1, tn), lambda i, j, k: (0, j)))
        operands.append(b2d)

    scratch_shapes = [] if acc_in_output else [pltpu.VMEM((tm, tn), jnp.float32)]

    itemsize = jnp.dtype(compute_dtype).itemsize
    cost = pl.CostEstimate(
        flops=2 * M * out_dim * in_dim,
        transcendentals=0,
        bytes_accessed=(
            M * Kp * itemsize
            + out_dim * Kp * itemsize
            + (out_dim * 4 if has_bias else 0)
            + M * out_dim * jnp.dtype(out_dtype).itemsize
        ),
    )

    kernel = functools.partial(
        _linear_kernel, has_bias=has_bias, acc_in_output=acc_in_output
    )

    out = pl.pallas_call(
        kernel,
        out_shape=jax.ShapeDtypeStruct((M, out_dim), out_dtype),
        grid_spec=pltpu.PrefetchScalarGridSpec(
            num_scalar_prefetch=0,
            grid=grid,
            in_specs=in_specs,
            out_specs=pl.BlockSpec((tm, tn), lambda i, j, k: (i, j)),
            scratch_shapes=scratch_shapes,
        ),
        compiler_params=pltpu.CompilerParams(
            dimension_semantics=("parallel", "parallel", "arbitrary"),
        ),
        cost_estimate=cost,
    )(*operands)

    return out.reshape(*lead, out_dim)


def xavier_uniform(key, out_dim, in_dim, gain=1.0, dtype=jnp.float32):
    # torch.nn.init.xavier_uniform_ with gain = calculate_gain('linear') = 1.0
    bound = gain * float(np.sqrt(6.0 / (in_dim + out_dim)))
    return jax.random.uniform(
        key, (out_dim, in_dim), dtype=dtype, minval=-bound, maxval=bound
    )


if __name__ == "__main__":
    key = jax.random.PRNGKey(0)
    k_x, k_w, k_b = jax.random.split(key, 3)

    batch, seq, in_dim, out_dim = 2, 8, 32, 64

    x = jax.random.normal(k_x, (batch, seq, in_dim), dtype=jnp.float32)
    weight = xavier_uniform(k_w, out_dim, in_dim, gain=1.0)
    # torch Linear bias default init: uniform(-1/sqrt(in_dim), 1/sqrt(in_dim)).
    b_bound = 1.0 / float(np.sqrt(in_dim))
    bias = jax.random.uniform(
        k_b, (out_dim,), dtype=jnp.float32, minval=-b_bound, maxval=b_bound
    )

    y = linear_forward(x, weight, bias)
    y = jax.block_until_ready(y)
    assert y.shape == (batch, seq, out_dim)

    # Reference 1 (tight): same bf16-rounded operands, f32 accumulation.
    x_np = np.asarray(x.astype(jnp.bfloat16)).astype(np.float32)
    w_np = np.asarray(weight.astype(jnp.bfloat16)).astype(np.float32)
    b_np = np.asarray(bias).astype(np.float32)
    y_ref = (x_np.reshape(-1, in_dim) @ w_np.T + b_np).reshape(batch, seq, out_dim)
    assert np.allclose(np.asarray(y), y_ref, atol=1e-4, rtol=1e-4)

    # Reference 2 (loose): full-f32 math, bounds the bf16 operand rounding.
    y_f32 = (
        np.asarray(x).reshape(-1, in_dim).astype(np.float32)
        @ np.asarray(weight).astype(np.float32).T
        + b_np
    ).reshape(batch, seq, out_dim)
    assert np.allclose(np.asarray(y), y_f32, atol=3e-2, rtol=3e-2)

    print("KERNEL_OK")
</pallas_src>

<mosaic_0001>
module attributes {stable_mosaic.version = 11 : i64} {
  func.func @_linear_kernel(%arg0: i32, %arg1: i32, %arg2: i32, %arg3: memref<16x32xbf16, #tpu.memory_space<vmem>>, %arg4: memref<128x32xbf16, #tpu.memory_space<vmem>>, %arg5: memref<1x128xf32, #tpu.memory_space<vmem>>, %arg6: memref<16x128xf32, #tpu.memory_space<vmem>>) attributes {dimension_semantics = [#tpu.dimension_semantics<parallel>, #tpu.dimension_semantics<parallel>, #tpu.dimension_semantics<arbitrary>], iteration_bounds = array<i64: 1, 1, 1>, scalar_prefetch = 0 : i64, scratch_operands = 0 : i64, tpu.core_type = #tpu.core_type<tc>, window_params = [{transform_indices = @transform_0, window_bounds = array<i64: 16, 32>}, {transform_indices = @transform_1, window_bounds = array<i64: 128, 32>}, {transform_indices = @transform_2, window_bounds = array<i64: 1, 128>}, {transform_indices = @transform_3, window_bounds = array<i64: 16, 128>}]} {
    %c0_i32 = arith.constant 0 : i32
    %0 = arith.cmpi eq, %arg2, %c0_i32 : i32
    %1 = arith.extui %0 : i1 to i32
    %c0_i32_0 = arith.constant 0 : i32
    %2 = arith.cmpi ne, %1, %c0_i32_0 : i32
    scf.if %2 {
      %cst_10 = arith.constant 0.000000e+00 : f32
      %12 = vector.broadcast %cst_10 : f32 to vector<16x128xf32>
      %c0_11 = arith.constant 0 : index
      %c0_12 = arith.constant 0 : index
      %13 = vector.load %arg6[%c0_11, %c0_12] : memref<16x128xf32, #tpu.memory_space<vmem>>, vector<16x128xf32>
      tpu.vector_store %arg6[%c0_11, %c0_12], %12 {strides = array<i32>} : memref<16x128xf32, #tpu.memory_space<vmem>>, vector<16x128xf32>,
    } else {
    }
    %c0 = arith.constant 0 : index
    %c0_1 = arith.constant 0 : index
    %3 = vector.load %arg6[%c0, %c0_1] : memref<16x128xf32, #tpu.memory_space<vmem>>, vector<16x128xf32>
    %c0_2 = arith.constant 0 : index
    %c0_3 = arith.constant 0 : index
    %4 = vector.load %arg3[%c0_2, %c0_3] : memref<16x32xbf16, #tpu.memory_space<vmem>>, vector<16x32xbf16>
    %c0_4 = arith.constant 0 : index
    %c0_5 = arith.constant 0 : index
    %5 = vector.load %arg4[%c0_4, %c0_5] : memref<128x32xbf16, #tpu.memory_space<vmem>>, vector<128x32xbf16>
    %cst = arith.constant dense<0.000000e+00> : vector<16x128xf32>
    %6 = tpu.matmul %4, %5, %cst {dimension_numbers = #tpu.dot_dimension_numbers<[1], [1], [0], [0], [0, 0, 1, 0], [], []>} : vector<16x32xbf16>, vector<128x32xbf16>, vector<16x128xf32> -> vector<16x128xf32>
    %7 = arith.addf %3, %6 : vector<16x128xf32>
    %c0_6 = arith.constant 0 : index
    %c0_7 = arith.constant 0 : index
    %8 = vector.load %arg6[%c0_6, %c0_7] : memref<16x128xf32, #tpu.memory_space<vmem>>, vector<16x128xf32>
    tpu.vector_store %arg6[%c0_6, %c0_7], %7 {strides = array<i32>} : memref<16x128xf32, #tpu.memory_space<vmem>>, vector<16x128xf32>,
    %c0_i32_8 = arith.constant 0 : i32
    %9 = arith.cmpi eq, %arg2, %c0_i32_8 : i32
    %10 = arith.extui %9 : i1 to i32
    %c0_i32_9 = arith.constant 0 : i32
    %11 = arith.cmpi ne, %10, %c0_i32_9 : i32
    scf.if %11 {
      %c0_10 = arith.constant 0 : index
      %c0_11 = arith.constant 0 : index
      %12 = vector.load %arg6[%c0_10, %c0_11] : memref<16x128xf32, #tpu.memory_space<vmem>>, vector<16x128xf32>
      %c0_12 = arith.constant 0 : index
      %c0_13 = arith.constant 0 : index
      %13 = vector.load %arg5[%c0_12, %c0_13] : memref<1x128xf32, #tpu.memory_space<vmem>>, vector<1x128xf32>
      %14 = vector.broadcast %13 : vector<1x128xf32> to vector<16x128xf32>
      %15 = arith.addf %12, %14 : vector<16x128xf32>
      %c0_14 = arith.constant 0 : index
      %c0_15 = arith.constant 0 : index
      %16 = vector.load %arg6[%c0_14, %c0_15] : memref<16x128xf32, #tpu.memory_space<vmem>>, vector<16x128xf32>
      tpu.vector_store %arg6[%c0_14, %c0_15], %15 {strides = array<i32>} : memref<16x128xf32, #tpu.memory_space<vmem>>, vector<16x128xf32>,
    } else {
    }
    return
  }
  func.func @transform_0(%arg0: i32, %arg1: i32, %arg2: i32) -> (i32, i32) {
    %c0_i32 = arith.constant 0 : i32
    return %arg0, %arg2 : i32, i32
  }
  func.func @transform_1(%arg0: i32, %arg1: i32, %arg2: i32) -> (i32, i32) {
    %c0_i32 = arith.constant 0 : i32
    return %arg1, %arg2 : i32, i32
  }
  func.func @transform_2(%arg0: i32, %arg1: i32, %arg2: i32) -> (i32, i32) {
    %c0_i32 = arith.constant 0 : i32
    %c0_i32_0 = arith.constant 0 : i32
    return %c0_i32, %arg1 : i32, i32
  }
  func.func @transform_3(%arg0: i32, %arg1: i32, %arg2: i32) -> (i32, i32) {
    %c0_i32 = arith.constant 0 : i32
    return %arg0, %arg1 : i32, i32
  }
}

</mosaic_0001>

<bundles_post_ra>
// kernel: tpu_custom_call.1
= control target key start
LH: loop header
LB: loop body
LE: loop exit
PB: predicated region body
PF: predicated region fallthrough
CT: control target
= control target key end

     0   :  { %v268_v1 = vmov 0.0   ;;  %vm87_vm0 = vcmask 261120   ;;  %vm269_vm1 = vmmov 0   ;;  %s335_s0 = inlined_call_operand.vmem [shape: bf16[16,32], index: 0, kind: input, shape index: {}]   ;;  %s336_s1 = inlined_call_operand.vmem [shape: bf16[64,32], index: 1, kind: input, shape index: {}]   ;;  %s337_s2 = inlined_call_operand.vmem [shape: f32[1,64], index: 2, kind: input, shape index: {}]   ;;  %s338_s3 = inlined_call_operand.hbm [shape: f32[16,64], index: 3, kind: output, shape index: {}]  }
   0x1   :  { %v237_v0 = vld [vmem:[%s336_s1 + $0x38] sm:$0xff]   ;;  %212 = vmatprep.subr.bf16.mxu0 %v268_v1  ;;  %v238_v3 = vld [vmem:[%s336_s1 + $0x30] sm:$0xff]   ;;  %228 = vmatprep.mubr.msk.bf16.mxu0 %vm269_vm1, %v268_v1 }
   0x2   :  { %v113_v2 = vsel %vm87_vm0, %v237_v0, 0  ;;  %v110_v4 = vsel %vm87_vm0, %v238_v3, 0 }
   0x3   :  { %213 = vmatpush3.bf16.xpose.msra.mxu0 %v113_v2 }
   0x4   :  { %214 = vmatprep.subr.bf16.mxu0 %v268_v1 }
   0x5   :  { %8 = vsyncpa [#allocation3], 0  ;;  %v239_v5 = vld [vmem:[%s336_s1 + $0x28] sm:$0xff]   ;;  %v240_v7 = vld [vmem:[%s336_s1 + $0x20] sm:$0xff]   ;;  %s270_s5 = smov [#allocation2]  }
   0x6   :  { %v107_v6 = vsel %vm87_vm0, %v239_v5, 0  ;;  %v104_v8 = vsel %vm87_vm0, %v240_v7, 0  ;;  %v241_v9 = vld [vmem:[%s336_s1 + $0x18] sm:$0xff]   ;;  %v242_v11 = vld [vmem:[%s336_s1 + $0x10] sm:$0xff]   ;;  %v243_v13 = vld [vmem:[%s336_s1 + $0x8] sm:$0xff]   ;;  %s181_s6 = sshll.u32 %s270_s5, 4  ;;  %s182_s6 = int_to_ptr.vmem [resolvable:$true] %s181_s6 }
   0x7   :  { %v101_v10 = vsel %vm87_vm0, %v241_v9, 0  ;;  %v98_v12 = vsel %vm87_vm0, %v242_v11, 0  ;;  %v95_v14 = vsel %vm87_vm0, %v243_v13, 0  ;;  %v244_v15 = vld [vmem:[%s336_s1] sm:$0xff]   ;;  %s246_s1 = scalar_lea.vmem %s182_s6, 256  ;;  %p251_p1 = scmp.lt.s32.totalorder %s182_s6, %s182_s6 }
   0x8   :  { %v92_v16 = vsel %vm87_vm0, %v244_v15, 0  ;;  %v245_v17 = vld [vmem:[%s335_s0] sm:$0xff]   ;;  %p247_p0 = scmp.ne.s32.totalorder %s182_s6, %s246_s1  ;;  %p252_p2 = scmp.lt.s32.totalorder %s246_s1, %s246_s1 }
   0x9   :  { %v202_v19 = vld [vmem:[%s337_s2] ss:$0 sm:$0xff] }
   0xa   :  { %p253_p3 = por %p252_p2, %p251_p1 }
   0xb   :  { %215 = vmatpush3.bf16.xpose.msra.mxu0 %v110_v4 }
   0xc   :  { %216 = vmatprep.subr.bf16.mxu0 %v268_v1  ;;  %p254_p4 = pnand %p253_p3, %p247_p0 }
  0x13   :  { %217 = vmatpush3.bf16.xpose.msra.mxu0 %v107_v6 }
  0x14   :  { %218 = vmatprep.subr.bf16.mxu0 %v268_v1 }
  0x1b   :  { %219 = vmatpush3.bf16.xpose.msra.mxu0 %v104_v8 }
  0x1c   :  { %220 = vmatprep.subr.bf16.mxu0 %v268_v1 }
  0x23   :  { %221 = vmatpush3.bf16.xpose.msra.mxu0 %v101_v10 }
  0x24   :  { %222 = vmatprep.subr.bf16.mxu0 %v268_v1 }
  0x2b   :  { %223 = vmatpush3.bf16.xpose.msra.mxu0 %v98_v12 }
  0x2c   :  { %224 = vmatprep.subr.bf16.mxu0 %v268_v1 }
  0x33   :  { %225 = vmatpush3.bf16.xpose.msra.mxu0 %v95_v14 }
  0x34   :  { %226 = vmatprep.subr.bf16.mxu0 %v268_v1 }
  0x3b   :  { %227 = vmatpush3.bf16.xpose.msra.mxu0 %v92_v16 }
  0x42   :  { %229 = vmatmul.mubr.msk.bf16.vlgmr.msra.gmra.mxu0 %vm87_vm0, %v245_v17 }
 0x102   :  { %v149_v18 = vpop.f32.mrf.mxu0 }
 0x103   :  { %v172_v21 = vadd.f32 %v202_v19, %v149_v18 }
 0x104   :  { %v230_v20 = vpop.f32.mrf.mxu0 }
 0x105   :  { %174 = vst [vmem:[#allocation2] sm:$0xff] %v172_v21 }
 0x106   :  { %v152_v22 = vpop.f32.mrf.mxu0 }
 0x107   :  { %v173_v24 = vadd.f32 %v202_v19, %v152_v22 }
 0x108   :  { %v231_v23 = vpop.f32.mrf.mxu0 }
 0x109   :  { %175 = vst [vmem:[#allocation2 + $0x8] sm:$0xff] %v173_v24 }
 0x10a   :  { %257 = shalt.err (!%p254_p4)
}
 0x10b   :  { %s271_s0 = smov 128   ;;  %s272_s7 = smov 8  }
 0x10c   :  { %187 = dma.vmem_to_hbm [thread:$0]  %s182_s6, 256, %s338_s3, [#allocation3], %s271_s0, %s271_s0, %s272_s7  }
 0x10d   :  { %266 = dma.done.wait [#allocation3], 256  }
 0x10e   :  { %267 = vsyncadd [#allocation3], 4294967040 }
 0x10f   :  { %191 = vsyncpa [#allocation3], 1 }

</bundles_post_ra>
